<compile_context>
chip_gen: v7x
topology: tpu7x:2x2x1
jax: 0.10.0
libtpu: 0.0.40
codegen_flags: <defaults>
</compile_context>

<pallas_src>
import functools

import jax
import jax.numpy as jnp
from jax.experimental import pallas as pl
from jax.experimental.pallas import tpu as pltpu

HIDDEN = 768                 # hard-coded by nn.Linear(768, 1) in the module
DROPOUT_P = 0.2
# keep iff bits >= threshold  =>  P(keep) = 0.8 + ~5e-11 (int() truncation of
# 0.2 * 2^32).  Intentional and negligible -- do NOT "fix" into a float compare.
_DROP_THRESHOLD = int(DROPOUT_P * (1 << 32))


def _round_up(x, m):
    return (x + m - 1) // m * m


def _detect_bf16_elementwise():
    """bf16 EUP/VPU exists on v6e and later; v5e (and CPU interpret) lack it."""
    try:
        kind = jax.devices()[0].device_kind.lower()
    except Exception:
        return False
    return ("v6" in kind) or ("v7" in kind) or ("tpu7" in kind)


_BF16_ELEMENTWISE = _detect_bf16_elementwise()


def _bert_head_kernel(*refs, training, elem_dtype):
    """Fused BERT-pooler + dropout + classifier head.

    training=True : (bc, cls, bits, wp, bp, wc, out)
    training=False: (bc, cls, wp, bp, wc, out)

    bc   : SMEM (1,)             f32     classifier bias
    cls  : VMEM (TILE_B, 768)    bf16    CLS-token hidden states (streamed)
    bits : VMEM (TILE_B, 768)    u32     dropout random bits (training only)
    wp   : VMEM (768, 768)       bf16    pooler dense weight (resident)
    bp   : VMEM (1, 768)         f32     pooler dense bias (resident)
    wc   : VMEM (1, 768)         f32     classifier weight, lane-major row
    out  : VMEM (TILE_B, 1)      f32     logits
    """
    if training:
        bc_ref, cls_ref, bits_ref, wp_ref, bp_ref, wc_ref, out_ref = refs
    else:
        bc_ref, cls_ref, wp_ref, bp_ref, wc_ref, out_ref = refs

    # BERT pooler: tanh(CLS @ Wp + bp).  bf16 MXU inputs, f32 accumulation.
    acc = jnp.dot(cls_ref[...], wp_ref[...],
                  preferred_element_type=jnp.float32) + bp_ref[...]
    # tanh (and the dropout select) run in bf16 on v6e/v7x (bf16 EUP/VPU) where
    # the EUP tanh is the binding VLIW slot; f32 on v5e.
    pooled = jnp.tanh(acc.astype(elem_dtype))

    if training:
        # Inverted dropout (p=0.2): keep iff bits >= floor(0.2 * 2^32).
        # TODO(synk): on-chip pltpu.prng_random_bits would avoid streaming the
        # 4 B/elem mask from HBM, but it has no CPU/interpret lowering; the
        # host-key bits also make the mask reproducible per training step.
        keep = bits_ref[...] >= jnp.uint32(_DROP_THRESHOLD)
        pooled = jnp.where(keep, pooled * (1.0 / (1.0 - DROPOUT_P)), 0.0)
    # else: eval-mode dropout is the identity.

    # Classifier Linear(768, 1): lane-major weight row -> VPU multiply + XLU
    # lane reduction in f32 (avoids an N=1 MXU matmul and its padded layout).
    logits = jnp.sum(pooled.astype(jnp.float32) * wc_ref[...],
                     axis=-1, keepdims=True) + bc_ref[0]
    # NOTE: output last-dim is 1 (masked lane store); negligible -- writeback
    # is B*4 bytes vs. the ~1.1 MiB bf16 weight stream.
    out_ref[...] = logits.astype(out_ref.dtype)


@functools.partial(jax.jit, static_argnames=("training",))
def multilingual_bert_classifier_forward(last_hidden_state, params,
                                         dropout_key=None, training=False):
    """last_hidden_state: [B, S, 768] (output of the external BERT encoder)."""
    wp, bp, wc_row, bc = params
    B = last_hidden_state.shape[0]

    # BERT pooler consumes the first (CLS) token only — glue done in plain JAX.
    cls = last_hidden_state[:, 0, :].astype(jnp.bfloat16)            # [B, 768]

    if training:
        if dropout_key is None:
            raise ValueError("training=True requires dropout_key")
        bits = jax.random.bits(dropout_key, (B, HIDDEN), dtype=jnp.uint32)
    else:
        bits = None

    # ---- batch tiling ----------------------------------------------------
    if B <= 128:
        # Single block; round to 16 rows (bf16 packs 16 rows per sublane
        # group).  Tiny pad only on this small-batch path.
        tile_b = _round_up(max(B, 16), 16)
        if tile_b != B:
            cls = jnp.pad(cls, ((0, tile_b - B), (0, 0)))
            if training:
                bits = jnp.pad(bits, ((0, tile_b - B), (0, 0)))
    else:
        # >= 2 blocks so "parallel" can shard across v7x's 2 TensorCores; up
        # to 512 rows/block to amortize per-step pipeline overhead and give
        # the 256x256 MXU a full-height M tile.  No jnp.pad: the ragged last
        # block is handled by Pallas (rows are independent; OOB writes drop).
        tile_b = min(512, _round_up(pl.cdiv(B, 2), 128))
    b_rows = cls.shape[0]
    num_blocks = pl.cdiv(b_rows, tile_b)

    smem = pltpu.MemorySpace.SMEM
    resident = lambda i: (0, 0)

    in_specs = [
        pl.BlockSpec(memory_space=smem),                          # bc (scalar)
        pl.BlockSpec((tile_b, HIDDEN), lambda i: (i, 0)),         # cls (streamed)
    ]
    inputs = [bc, cls]
    if training:
        in_specs.append(pl.BlockSpec((tile_b, HIDDEN), lambda i: (i, 0)))  # bits
        inputs.append(bits)
    in_specs += [
        pl.BlockSpec((HIDDEN, HIDDEN), resident),                 # wp (resident)
        pl.BlockSpec((1, HIDDEN), resident),                      # bp (resident)
        pl.BlockSpec((1, HIDDEN), resident),                      # wc (resident)
    ]
    inputs += [wp, bp, wc_row]

    elem_dtype = jnp.bfloat16 if _BF16_ELEMENTWISE else jnp.float32
    kernel = functools.partial(_bert_head_kernel, training=training,
                               elem_dtype=elem_dtype)

    flops = 2 * B * HIDDEN * HIDDEN + 4 * B * HIDDEN
    bytes_accessed = (B * HIDDEN * 2            # cls (bf16)
                      + HIDDEN * HIDDEN * 2     # wp  (bf16)
                      + 2 * HIDDEN * 4          # bp + wc
                      + B * 4)                  # logits
    if training:
        bytes_accessed += B * HIDDEN * 4        # dropout bits
    cost = pl.CostEstimate(flops=flops, transcendentals=B * HIDDEN,
                           bytes_accessed=bytes_accessed)

    out = pl.pallas_call(
        kernel,
        out_shape=jax.ShapeDtypeStruct((b_rows, 1), jnp.float32),
        grid=(num_blocks,),
        in_specs=in_specs,
        out_specs=pl.BlockSpec((tile_b, 1), lambda i: (i, 0)),
        compiler_params=pltpu.CompilerParams(
            dimension_semantics=("parallel",)),
        cost_estimate=cost,
    )(*inputs)
    return out[:B]


def init_params(key):
    """Deterministic parameter init (shapes from the module's __init__)."""
    k_wp, k_wc, k_bc = jax.random.split(key, 3)
    # BERT pooler dense (768 -> 768): stored in bf16 (native MXU input).
    # TODO(synk): the pretrained multilingual BERT encoder itself is an
    # injected dependency and is not re-implemented here.
    wp = (0.02 * jax.random.normal(k_wp, (HIDDEN, HIDDEN),
                                   dtype=jnp.float32)).astype(jnp.bfloat16)
    bp = jnp.zeros((1, HIDDEN), dtype=jnp.float32)
    # nn.Linear(768, 1): U(-1/sqrt(768), 1/sqrt(768)); weight kept lane-major.
    bound = 1.0 / (HIDDEN ** 0.5)
    wc_row = jax.random.uniform(k_wc, (1, HIDDEN), dtype=jnp.float32,
                                minval=-bound, maxval=bound)
    bc = jax.random.uniform(k_bc, (1,), dtype=jnp.float32,
                            minval=-bound, maxval=bound)
    return wp, bp, wc_row, bc


if __name__ == "__main__":
    key = jax.random.PRNGKey(0)
    k_params, k_x, k_drop = jax.random.split(key, 3)

    B, S = 8, 8                                  # small batch / seq
    params = init_params(k_params)
    last_hidden_state = jax.random.normal(k_x, (B, S, HIDDEN), dtype=jnp.float32)

    # Eval-mode forward (dropout == identity), matching typical inference use.
    logits = multilingual_bert_classifier_forward(last_hidden_state, params,
                                                  training=False)
    logits = jax.block_until_ready(logits)

    # Training-mode forward (host-key dropout bits streamed to the kernel).
    logits_tr = multilingual_bert_classifier_forward(
        last_hidden_state, params, dropout_key=k_drop, training=True)
    logits_tr = jax.block_until_ready(logits_tr)

    # Pure-JAX reference (same bf16-quantized matmul operands the kernel sees).
    wp, bp, wc_row, bc = params
    cls32 = last_hidden_state[:, 0, :].astype(jnp.bfloat16).astype(jnp.float32)
    wp32 = wp.astype(jnp.float32)
    pooled_ref = jnp.tanh(
        jnp.dot(cls32, wp32, precision=jax.lax.Precision.HIGHEST) + bp)
    ref = jnp.sum(pooled_ref * wc_row, axis=-1, keepdims=True) + bc[0]

    bits_ref = jax.random.bits(k_drop, (B, HIDDEN), dtype=jnp.uint32)
    keep_ref = bits_ref >= jnp.uint32(_DROP_THRESHOLD)
    pooled_drop = jnp.where(keep_ref, pooled_ref / (1.0 - DROPOUT_P), 0.0)
    ref_tr = jnp.sum(pooled_drop * wc_row, axis=-1, keepdims=True) + bc[0]

    # Looser tolerance when the elementwise path runs in bf16 (v6e/v7x).
    tol = 3e-2 if _BF16_ELEMENTWISE else 1e-3
    assert logits.shape == (B, 1)
    assert logits_tr.shape == (B, 1)
    assert jnp.allclose(logits, ref, atol=tol, rtol=tol)
    assert jnp.allclose(logits_tr, ref_tr, atol=tol, rtol=tol)

    print("KERNEL_OK")
</pallas_src>

<mosaic_0001>
module attributes {stable_mosaic.version = 11 : i64} {
  func.func @_bert_head_kernel(%arg0: i32, %arg1: memref<1xf32, #tpu.memory_space<smem>>, %arg2: memref<16x768xbf16, #tpu.memory_space<vmem>>, %arg3: memref<768x768xbf16, #tpu.memory_space<vmem>>, %arg4: memref<1x768xf32, #tpu.memory_space<vmem>>, %arg5: memref<1x768xf32, #tpu.memory_space<vmem>>, %arg6: memref<16x1xf32, #tpu.memory_space<vmem>>) attributes {dimension_semantics = [#tpu.dimension_semantics<parallel>], iteration_bounds = array<i64: 1>, scalar_prefetch = 0 : i64, scratch_operands = 0 : i64, tpu.core_type = #tpu.core_type<tc>, window_params = [{transform_indices = @transform_0, window_bounds = array<i64: 1>}, {transform_indices = @transform_1, window_bounds = array<i64: 16, 768>}, {pipeline_mode = #tpu.pipeline_mode<synchronous>, transform_indices = @transform_2, window_bounds = array<i64: 768, 768>}, {pipeline_mode = #tpu.pipeline_mode<synchronous>, transform_indices = @transform_3, window_bounds = array<i64: 1, 768>}, {pipeline_mode = #tpu.pipeline_mode<synchronous>, transform_indices = @transform_4, window_bounds = array<i64: 1, 768>}, {transform_indices = @transform_5, window_bounds = array<i64: 16, 1>}]} {
    %c0 = arith.constant 0 : index
    %c0_0 = arith.constant 0 : index
    %0 = vector.load %arg2[%c0, %c0_0] : memref<16x768xbf16, #tpu.memory_space<vmem>>, vector<16x768xbf16>
    %c0_1 = arith.constant 0 : index
    %c0_2 = arith.constant 0 : index
    %1 = vector.load %arg3[%c0_1, %c0_2] : memref<768x768xbf16, #tpu.memory_space<vmem>>, vector<768x768xbf16>
    %cst = arith.constant dense<0.000000e+00> : vector<16x768xf32>
    %2 = tpu.matmul %0, %1, %cst {dimension_numbers = #tpu.dot_dimension_numbers<[1], [0], [0], [1], [0, 0, 1, 1], [], []>} : vector<16x768xbf16>, vector<768x768xbf16>, vector<16x768xf32> -> vector<16x768xf32>
    %c0_3 = arith.constant 0 : index
    %c0_4 = arith.constant 0 : index
    %3 = vector.load %arg4[%c0_3, %c0_4] : memref<1x768xf32, #tpu.memory_space<vmem>>, vector<1x768xf32>
    %4 = vector.broadcast %3 : vector<1x768xf32> to vector<16x768xf32>
    %5 = arith.addf %2, %4 : vector<16x768xf32>
    %6 = math.tanh %5 : vector<16x768xf32>
    %c0_5 = arith.constant 0 : index
    %c0_6 = arith.constant 0 : index
    %7 = vector.load %arg5[%c0_5, %c0_6] : memref<1x768xf32, #tpu.memory_space<vmem>>, vector<1x768xf32>
    %8 = vector.broadcast %7 : vector<1x768xf32> to vector<16x768xf32>
    %9 = arith.mulf %6, %8 : vector<16x768xf32>
    %cst_7 = arith.constant dense<0.000000e+00> : vector<16xf32>
    %10 = vector.multi_reduction <add>, %9, %cst_7 [1] : vector<16x768xf32> to vector<16xf32>
    %11 = vector.shape_cast %10 : vector<16xf32> to vector<16x1xf32>
    %c0_8 = arith.constant 0 : index
    %12 = memref.load %arg1[%c0_8] : memref<1xf32, #tpu.memory_space<smem>>
    %13 = vector.broadcast %12 : f32 to vector<16x1xf32>
    %14 = arith.addf %11, %13 : vector<16x1xf32>
    %c0_9 = arith.constant 0 : index
    %c0_10 = arith.constant 0 : index
    %15 = vector.load %arg6[%c0_9, %c0_10] : memref<16x1xf32, #tpu.memory_space<vmem>>, vector<16x1xf32>
    tpu.vector_store %arg6[%c0_9, %c0_10], %14 {strides = array<i32>} : memref<16x1xf32, #tpu.memory_space<vmem>>, vector<16x1xf32>,
    return
  }
  func.func @transform_0(%arg0: i32) -> i32 {
    %c0_i32 = arith.constant 0 : i32
    %c0_i32_0 = arith.constant 0 : i32
    return %c0_i32 : i32
  }
  func.func @transform_1(%arg0: i32) -> (i32, i32) {
    %c0_i32 = arith.constant 0 : i32
    %c0_i32_0 = arith.constant 0 : i32
    return %arg0, %c0_i32 : i32, i32
  }
  func.func @transform_2(%arg0: i32) -> (i32, i32) {
    %c0_i32 = arith.constant 0 : i32
    %c0_i32_0 = arith.constant 0 : i32
    %c0_i32_1 = arith.constant 0 : i32
    return %c0_i32, %c0_i32_0 : i32, i32
  }
  func.func @transform_3(%arg0: i32) -> (i32, i32) {
    %c0_i32 = arith.constant 0 : i32
    %c0_i32_0 = arith.constant 0 : i32
    %c0_i32_1 = arith.constant 0 : i32
    return %c0_i32, %c0_i32_0 : i32, i32
  }
  func.func @transform_4(%arg0: i32) -> (i32, i32) {
    %c0_i32 = arith.constant 0 : i32
    %c0_i32_0 = arith.constant 0 : i32
    %c0_i32_1 = arith.constant 0 : i32
    return %c0_i32, %c0_i32_0 : i32, i32
  }
  func.func @transform_5(%arg0: i32) -> (i32, i32) {
    %c0_i32 = arith.constant 0 : i32
    %c0_i32_0 = arith.constant 0 : i32
    return %arg0, %c0_i32 : i32, i32
  }
}

</mosaic_0001>

<bundles_post_ra>
// kernel: multilingual_bert_classifier_forward.1
= control target key start
LH: loop header
LB: loop body
LE: loop exit
PB: predicated region body
PF: predicated region fallthrough
CT: control target
= control target key end

     0   :  { %11 = vsyncpa [#allocation4], 0  ;;  %s3351_s0 = inlined_call_operand.<no memory space> [shape: f32[1], index: 0, kind: input, shape index: {}]   ;;  %s3352_s1 = inlined_call_operand.vmem [shape: bf16[16,768], index: 1, kind: input, shape index: {}]   ;;  %s3353_s2 = inlined_call_operand.hbm [shape: bf16[768,768], index: 2, kind: input, shape index: {}]   ;;  %s3354_s3 = inlined_call_operand.hbm [shape: f32[1,768], index: 3, kind: input, shape index: {}]   ;;  %s3355_s4 = inlined_call_operand.hbm [shape: f32[1,768], index: 4, kind: input, shape index: {}]   ;;  %s3356_s5 = inlined_call_operand.vmem [shape: f32[16,1], index: 5, kind: output, shape index: {}]  }
   0x1   :  { %12 = vsyncpa [#allocation6], 0  ;;  %s3196_s18 = smov [#allocation5]   ;;  %s3197_s20 = smov [#allocation3]  }
   0x2   :  { %s35_s19 = sshll.u32 %s3196_s18, 4  ;;  %s22_s21 = sshll.u32 %s3197_s20, 4  ;;  %s36_s19 = int_to_ptr.vmem [resolvable:$true] %s35_s19  ;;  %s3231_s21 = int_to_ptr.vmem [resolvable:$true] %s22_s21 }
   0x3   :  { %s3126_s24 = scalar_lea.hbm %s3354_s3, 96 }
   0x4   :  { %p3127_p0 = scmp.ne.s32.totalorder %s3354_s3, %s3126_s24  ;;  %p3130_p1 = scmp.lt.u32.totalorder %s3126_s24, %s3354_s3 }
   0x6   :  { %p3132_p2 = pnand %p3130_p1, %p3127_p0 }
   0x8   :  { %3135 = shalt.err (!%p3132_p2)
}
   0x9   :  { %s3136_s29 = scalar_lea.vmem %s36_s19, 96  ;;  %p3141_p4 = scmp.lt.s32.totalorder %s36_s19, %s36_s19 }
   0xa   :  { %p3137_p3 = scmp.ne.s32.totalorder %s36_s19, %s3136_s29  ;;  %p3142_p5 = scmp.lt.s32.totalorder %s3136_s29, %s3136_s29 }
   0xc   :  { %p3143_p6 = por %p3142_p5, %p3141_p4 }
   0xe   :  { %p3144_p7 = pnand %p3143_p6, %p3137_p3 }
  0x10   :  { %3147 = shalt.err (!%p3144_p7)
}
  0x11   :  { %38 = dma.hbm_to_vmem [thread:$0]  %s3354_s3, 96, %s36_s19, [#allocation6]  }
  0x12   :  { %s3148_s9 = scalar_lea.hbm %s3353_s2, 36864 }
  0x13   :  { %p3149_p8 = scmp.ne.s32.totalorder %s3353_s2, %s3148_s9  ;;  %p3152_p9 = scmp.lt.u32.totalorder %s3148_s9, %s3353_s2 }
  0x15   :  { %p3154_p10 = pnand %p3152_p9, %p3149_p8 }
  0x17   :  { %3157 = shalt.err (!%p3154_p10)
}
  0x18   :  { %s3158_s14 = scalar_lea.vmem %s3231_s21, 36864  ;;  %p3163_p12 = scmp.lt.s32.totalorder %s3231_s21, %s3231_s21 }
  0x19   :  { %p3159_p11 = scmp.ne.s32.totalorder %s3231_s21, %s3158_s14  ;;  %p3164_p13 = scmp.lt.s32.totalorder %s3158_s14, %s3158_s14 }
  0x1b   :  { %p3165_p0 = por %p3164_p13, %p3163_p12 }
  0x1d   :  { %p3166_p1 = pnand %p3165_p0, %p3159_p11 }
  0x1f   :  { %3169 = shalt.err (!%p3166_p1)
}
  0x20   :  { %s3198_s3 = smov 384   ;;  %s3199_s15 = smov 24  }
  0x21   :  { %28 = dma.hbm_to_vmem [thread:$0]  %s3353_s2, 36864, %s3231_s21, [#allocation4], %s3198_s3, %s3198_s3, %s3199_s15  }
  0x22   :  { %s3200_s18 = smov [#allocation7]   ;;  %s3170_s23 = scalar_lea.hbm %s3355_s4, 96 }
  0x23   :  { %s45_s19 = sshll.u32 %s3200_s18, 4  ;;  %p3171_p2 = scmp.ne.s32.totalorder %s3355_s4, %s3170_s23  ;;  %s46_s19 = int_to_ptr.vmem [resolvable:$true] %s45_s19 }
  0x24   :  { %p3174_p3 = scmp.lt.u32.totalorder %s3170_s23, %s3355_s4 }
  0x26   :  { %p3176_p4 = pnand %p3174_p3, %p3171_p2 }
  0x28   :  { %3179 = shalt.err (!%p3176_p4)
}
  0x29   :  { %s3180_s28 = scalar_lea.vmem %s46_s19, 96  ;;  %p3185_p6 = scmp.lt.s32.totalorder %s46_s19, %s46_s19 }
  0x2a   :  { %p3181_p5 = scmp.ne.s32.totalorder %s46_s19, %s3180_s28  ;;  %p3186_p7 = scmp.lt.s32.totalorder %s3180_s28, %s3180_s28 }
  0x2c   :  { %p3187_p8 = por %p3186_p7, %p3185_p6 }
  0x2e   :  { %p3188_p9 = pnand %p3187_p8, %p3181_p5 }
  0x30   :  { %3191 = shalt.err (!%p3188_p9)
}
  0x31   :  { %48 = dma.hbm_to_vmem [thread:$0]  %s3355_s4, 96, %s46_s19, [#allocation6]  }
  0x32   :  { %3192 = dma.done.wait [#allocation4], 36864  }
  0x33   :  { %3193 = vsyncadd [#allocation4], 4294930432 }
  0x34   :  { %3194 = dma.done.wait [#allocation6], 192  }
  0x35   :  { %3195 = vsyncadd [#allocation6], 4294967104  ;;  %v2659_v0 = vld [vmem:[#allocation3 + $0x4] ss:$24 sps:$4 sm:$0xff]   ;;  %v2663_v2 = vld [vmem:[#allocation3] ss:$24 sps:$4 sm:$0xff]  }
  0x36   :  { %v2661_v1 = vld [vmem:[#allocation3 + $0x304] ss:$24 sps:$4 sm:$0xff]   ;;  %1854 = vmatprep.subr.bf16.mxu1 %v2659_v0  ;;  %v2664_v3 = vld [vmem:[#allocation3 + $0x300] ss:$24 sps:$4 sm:$0xff]   ;;  %v2665_v4 = vld [vmem:[#allocation3 + $0x34] ss:$24 sps:$4 sm:$0xff]  }
  0x37   :  { %1897 = vmatprep.subr.bf16.mxu0 %v2661_v1  ;;  %1855 = vmatpush1.bf16.msra.mxu1 %v2663_v2  ;;  %v2667_v5 = vld [vmem:[#allocation3 + $0x334] ss:$24 sps:$4 sm:$0xff]   ;;  %v2669_v6 = vld [vmem:[#allocation3 + $0x30] ss:$24 sps:$4 sm:$0xff]   ;;  %v2671_v8 = vld [vmem:[#allocation3 + $0x64] ss:$24 sps:$4 sm:$0xff]  }
  0x38   :  { %1898 = vmatpush1.bf16.msra.mxu0 %v2664_v3  ;;  %1856 = vmatprep.subr.bf16.mxu1 %v2665_v4  ;;  %v2670_v7 = vld [vmem:[#allocation3 + $0x330] ss:$24 sps:$4 sm:$0xff]   ;;  %v2673_v9 = vld [vmem:[#allocation3 + $0x364] ss:$24 sps:$4 sm:$0xff]   ;;  %v2675_v10 = vld [vmem:[#allocation3 + $0x60] ss:$24 sps:$4 sm:$0xff]  }
  0x39   :  { %1899 = vmatprep.subr.bf16.mxu0 %v2667_v5  ;;  %v2676_v11 = vld [vmem:[#allocation3 + $0x360] ss:$24 sps:$4 sm:$0xff]   ;;  %v2677_v12 = vld [vmem:[#allocation3 + $0x94] ss:$24 sps:$4 sm:$0xff]   ;;  %v2681_v14 = vld [vmem:[#allocation3 + $0x90] ss:$24 sps:$4 sm:$0xff]  }
  0x3a   :  { %v2679_v13 = vld [vmem:[#allocation3 + $0x394] ss:$24 sps:$4 sm:$0xff]   ;;  %v2682_v15 = vld [vmem:[#allocation3 + $0x390] ss:$24 sps:$4 sm:$0xff]   ;;  %v2683_v16 = vld [vmem:[#allocation3 + $0xc4] ss:$24 sps:$4 sm:$0xff]  }
  0x3b   :  { %1857 = vmatpush1.bf16.msra.mxu1 %v2669_v6  ;;  %v2685_v17 = vld [vmem:[#allocation3 + $0x3c4] ss:$24 sps:$4 sm:$0xff]   ;;  %v2687_v18 = vld [vmem:[#allocation3 + $0xc0] ss:$24 sps:$4 sm:$0xff]   ;;  %v2689_v20 = vld [vmem:[#allocation3 + $0xf4] ss:$24 sps:$4 sm:$0xff]  }
  0x3c   :  { %1900 = vmatpush1.bf16.msra.mxu0 %v2670_v7  ;;  %1858 = vmatprep.subr.bf16.mxu1 %v2671_v8  ;;  %v2688_v19 = vld [vmem:[#allocation3 + $0x3c0] ss:$24 sps:$4 sm:$0xff]   ;;  %v2691_v21 = vld [vmem:[#allocation3 + $0x3f4] ss:$24 sps:$4 sm:$0xff]   ;;  %v2693_v22 = vld [vmem:[#allocation3 + $0xf0] ss:$24 sps:$4 sm:$0xff]  }
  0x3d   :  { %1901 = vmatprep.subr.bf16.mxu0 %v2673_v9  ;;  %v2694_v23 = vld [vmem:[#allocation3 + $0x3f0] ss:$24 sps:$4 sm:$0xff]   ;;  %v2695_v24 = vld [vmem:[#allocation3 + $0x124] ss:$24 sps:$4 sm:$0xff]   ;;  %v2699_v26 = vld [vmem:[#allocation3 + $0x120] ss:$24 sps:$4 sm:$0xff]  }
  0x3e   :  { %v2697_v25 = vld [vmem:[#allocation3 + $0x424] ss:$24 sps:$4 sm:$0xff]   ;;  %v2700_v27 = vld [vmem:[#allocation3 + $0x420] ss:$24 sps:$4 sm:$0xff]   ;;  %v2701_v28 = vld [vmem:[#allocation3 + $0x154] ss:$24 sps:$4 sm:$0xff]  }
  0x3f   :  { %1859 = vmatpush1.bf16.msra.mxu1 %v2675_v10  ;;  %v2703_v29 = vld [vmem:[#allocation3 + $0x454] ss:$24 sps:$4 sm:$0xff]   ;;  %v2705_v30 = vld [vmem:[#allocation3 + $0x150] ss:$24 sps:$4 sm:$0xff]   ;;  %v2707_v32 = vld [vmem:[#allocation3 + $0x184] ss:$24 sps:$4 sm:$0xff]  }
  0x40   :  { %1902 = vmatpush1.bf16.msra.mxu0 %v2676_v11  ;;  %1860 = vmatprep.subr.bf16.mxu1 %v2677_v12  ;;  %v2706_v31 = vld [vmem:[#allocation3 + $0x450] ss:$24 sps:$4 sm:$0xff]   ;;  %v2709_v33 = vld [vmem:[#allocation3 + $0x484] ss:$24 sps:$4 sm:$0xff]   ;;  %v2711_v34 = vld [vmem:[#allocation3 + $0x180] ss:$24 sps:$4 sm:$0xff]  }
  0x41   :  { %1903 = vmatprep.subr.bf16.mxu0 %v2679_v13  ;;  %v2712_v35 = vld [vmem:[#allocation3 + $0x480] ss:$24 sps:$4 sm:$0xff]   ;;  %v2713_v36 = vld [vmem:[#allocation3 + $0x1b4] ss:$24 sps:$4 sm:$0xff]   ;;  %v2717_v38 = vld [vmem:[#allocation3 + $0x1b0] ss:$24 sps:$4 sm:$0xff]  }
  0x42   :  { %v2715_v37 = vld [vmem:[#allocation3 + $0x4b4] ss:$24 sps:$4 sm:$0xff]   ;;  %v2718_v39 = vld [vmem:[#allocation3 + $0x4b0] ss:$24 sps:$4 sm:$0xff]   ;;  %v2719_v40 = vld [vmem:[#allocation3 + $0x1e4] ss:$24 sps:$4 sm:$0xff]  }
  0x43   :  { %1861 = vmatpush1.bf16.msra.mxu1 %v2681_v14  ;;  %v2721_v41 = vld [vmem:[#allocation3 + $0x4e4] ss:$24 sps:$4 sm:$0xff]   ;;  %v2723_v42 = vld [vmem:[#allocation3 + $0x1e0] ss:$24 sps:$4 sm:$0xff]   ;;  %v2725_v44 = vld [vmem:[#allocation3 + $0x214] ss:$24 sps:$4 sm:$0xff]  }
  0x44   :  { %1904 = vmatpush1.bf16.msra.mxu0 %v2682_v15  ;;  %1862 = vmatprep.subr.bf16.mxu1 %v2683_v16  ;;  %v2724_v43 = vld [vmem:[#allocation3 + $0x4e0] ss:$24 sps:$4 sm:$0xff]   ;;  %v2727_v45 = vld [vmem:[#allocation3 + $0x514] ss:$24 sps:$4 sm:$0xff]   ;;  %v2729_v46 = vld [vmem:[#allocation3 + $0x210] ss:$24 sps:$4 sm:$0xff]  }
  0x45   :  { %1905 = vmatprep.subr.bf16.mxu0 %v2685_v17  ;;  %v2730_v47 = vld [vmem:[#allocation3 + $0x510] ss:$24 sps:$4 sm:$0xff]   ;;  %v3277_v48 = vld [vmem:[%s3352_s1 + $0x4] ss:$24 sps:$4 sm:$0xff]   ;;  %v2735_v52 = vld [vmem:[#allocation3 + $0x240] ss:$24 sps:$4 sm:$0xff]  }
  0x46   :  { %v3282_v49 = vld [vmem:[%s3352_s1 + $0xc] ss:$24 sps:$4 sm:$0xff]   ;;  %1886 = vmatprep.mubr.bf16.mxu1 %v3277_v48  ;;  %v2736_v53 = vld [vmem:[#allocation3 + $0x540] ss:$24 sps:$4 sm:$0xff]   ;;  %v2741_v56 = vld [vmem:[#allocation3 + $0x270] ss:$24 sps:$4 sm:$0xff]  }
  0x47   :  { %1863 = vmatpush1.bf16.msra.mxu1 %v2687_v18  ;;  %v2731_v50 = vld [vmem:[#allocation3 + $0x244] ss:$24 sps:$4 sm:$0xff]   ;;  %1929 = vmatprep.mubr.bf16.mxu0 %v3282_v49  ;;  %v2737_v54 = vld [vmem:[#allocation3 + $0x274] ss:$24 sps:$4 sm:$0xff]   ;;  %v2742_v57 = vld [vmem:[#allocation3 + $0x570] ss:$24 sps:$4 sm:$0xff]  }
  0x48   :  { %1906 = vmatpush1.bf16.msra.mxu0 %v2688_v19  ;;  %1864 = vmatprep.subr.bf16.mxu1 %v2689_v20  ;;  %v2733_v51 = vld [vmem:[#allocation3 + $0x544] ss:$24 sps:$4 sm:$0xff]   ;;  %v2739_v55 = vld [vmem:[#allocation3 + $0x574] ss:$24 sps:$4 sm:$0xff]   ;;  %v2747_v60 = vld [vmem:[#allocation3 + $0x2a0] ss:$24 sps:$4 sm:$0xff]  }
  0x49   :  { %1907 = vmatprep.subr.bf16.mxu0 %v2691_v21  ;;  %v2743_v58 = vld [vmem:[#allocation3 + $0x2a4] ss:$24 sps:$4 sm:$0xff]   ;;  %v2748_v61 = vld [vmem:[#allocation3 + $0x5a0] ss:$24 sps:$4 sm:$0xff]   ;;  %v2749_v62 = vld [vmem:[#allocation3 + $0x2d4] ss:$24 sps:$4 sm:$0xff]  }
  0x4a   :  { %v2745_v59 = vld [vmem:[#allocation3 + $0x5a4] ss:$24 sps:$4 sm:$0xff]   ;;  %v2751_v63 = vld [vmem:[#allocation3 + $0x5d4] ss:$24 sps:$4 sm:$0xff]   ;;  %v2753_v0 = vld [vmem:[#allocation3 + $0x2d0] ss:$24 sps:$4 sm:$0xff]  }
  0x4b   :  { %1865 = vmatpush1.bf16.msra.mxu1 %v2693_v22  ;;  %v2754_v1 = vld [vmem:[#allocation3 + $0x5d0] ss:$24 sps:$4 sm:$0xff]   ;;  %v2761_v2 = vld [vmem:[#allocation3 + $0x604] ss:$24 sps:$4 sm:$0xff]   ;;  %v2759_v4 = vld [vmem:[#allocation3 + $0x600] ss:$24 sps:$4 sm:$0xff]  }
  0x4c   :  { %1908 = vmatpush1.bf16.msra.mxu0 %v2694_v23  ;;  %1866 = vmatprep.subr.bf16.mxu1 %v2695_v24  ;;  %v2764_v3 = vld [vmem:[#allocation3 + $0xc] ss:$24 sps:$4 sm:$0xff]   ;;  %v2762_v5 = vld [vmem:[#allocation3 + $0x8] ss:$24 sps:$4 sm:$0xff]   ;;  %v2772_v9 = vld [vmem:[#allocation3 + $0x3c] ss:$24 sps:$4 sm:$0xff]  }
  0x4d   :  { %1909 = vmatprep.subr.bf16.mxu0 %v2697_v25  ;;  %v3289_v6 = vld [vmem:[%s3352_s1] ss:$24 sps:$4 sm:$0xff]   ;;  %v2769_v8 = vld [vmem:[#allocation3 + $0x634] ss:$24 sps:$4 sm:$0xff]   ;;  %v2767_v10 = vld [vmem:[#allocation3 + $0x630] ss:$24 sps:$4 sm:$0xff]  }
  0x4e   :  { %v3294_v7 = vld [vmem:[%s3352_s1 + $0x8] ss:$24 sps:$4 sm:$0xff]   ;;  %v2770_v11 = vld [vmem:[#allocation3 + $0x38] ss:$24 sps:$4 sm:$0xff]   ;;  %v2775_v12 = vld [vmem:[#allocation3 + $0x664] ss:$24 sps:$4 sm:$0xff]  }
  0x4f   :  { %1867 = vmatpush1.bf16.msra.mxu1 %v2699_v26  ;;  %v2778_v13 = vld [vmem:[#allocation3 + $0x6c] ss:$24 sps:$4 sm:$0xff]   ;;  %v2773_v14 = vld [vmem:[#allocation3 + $0x660] ss:$24 sps:$4 sm:$0xff]   ;;  %v2784_v17 = vld [vmem:[#allocation3 + $0x9c] ss:$24 sps:$4 sm:$0xff]  }
  0x50   :  { %1910 = vmatpush1.bf16.msra.mxu0 %v2700_v27  ;;  %1868 = vmatprep.subr.bf16.mxu1 %v2701_v28  ;;  %v2776_v15 = vld [vmem:[#allocation3 + $0x68] ss:$24 sps:$4 sm:$0xff]   ;;  %v2781_v16 = vld [vmem:[#allocation3 + $0x694] ss:$24 sps:$4 sm:$0xff]   ;;  %v2782_v19 = vld [vmem:[#allocation3 + $0x98] ss:$24 sps:$4 sm:$0xff]  }
  0x51   :  { %1911 = vmatprep.subr.bf16.mxu0 %v2703_v29  ;;  %v2779_v18 = vld [vmem:[#allocation3 + $0x690] ss:$24 sps:$4 sm:$0xff]   ;;  %v2787_v20 = vld [vmem:[#allocation3 + $0x6c4] ss:$24 sps:$4 sm:$0xff]   ;;  %v2785_v22 = vld [vmem:[#allocation3 + $0x6c0] ss:$24 sps:$4 sm:$0xff]  }
  0x52   :  { %v2790_v21 = vld [vmem:[#allocation3 + $0xcc] ss:$24 sps:$4 sm:$0xff]   ;;  %v2788_v23 = vld [vmem:[#allocation3 + $0xc8] ss:$24 sps:$4 sm:$0xff]   ;;  %v2796_v25 = vld [vmem:[#allocation3 + $0xfc] ss:$24 sps:$4 sm:$0xff]  }
  0x53   :  { %1869 = vmatpush1.bf16.msra.mxu1 %v2705_v30  ;;  %v2793_v24 = vld [vmem:[#allocation3 + $0x6f4] ss:$24 sps:$4 sm:$0xff]   ;;  %v2791_v26 = vld [vmem:[#allocation3 + $0x6f0] ss:$24 sps:$4 sm:$0xff]   ;;  %v2799_v28 = vld [vmem:[#allocation3 + $0x724] ss:$24 sps:$4 sm:$0xff]  }
  0x54   :  { %1912 = vmatpush1.bf16.msra.mxu0 %v2706_v31  ;;  %1870 = vmatprep.subr.bf16.mxu1 %v2707_v32  ;;  %v2794_v27 = vld [vmem:[#allocation3 + $0xf8] ss:$24 sps:$4 sm:$0xff]   ;;  %v2802_v29 = vld [vmem:[#allocation3 + $0x12c] ss:$24 sps:$4 sm:$0xff]   ;;  %v2800_v31 = vld [vmem:[#allocation3 + $0x128] ss:$24 sps:$4 sm:$0xff]  }
  0x55   :  { %1913 = vmatprep.subr.bf16.mxu0 %v2709_v33  ;;  %v2797_v30 = vld [vmem:[#allocation3 + $0x720] ss:$24 sps:$4 sm:$0xff]   ;;  %v2805_v32 = vld [vmem:[#allocation3 + $0x754] ss:$24 sps:$4 sm:$0xff]   ;;  %vm2315_vm0 = vcmask 7168  }
  0x56   :  { %v2808_v33 = vld [vmem:[#allocation3 + $0x15c] ss:$24 sps:$4 sm:$0xff]  }
  0x57   :  { %1871 = vmatpush1.bf16.msra.mxu1 %v2711_v34  ;;  %v3302_v34 = vld [vmem:[%s3352_s1 + $0x14] ss:$24 sps:$4 sm:$0xff]  }
  0x58   :  { %1914 = vmatpush1.bf16.msra.mxu0 %v2712_v35  ;;  %1872 = vmatprep.subr.bf16.mxu1 %v2713_v36  ;;  %v2803_v35 = vld [vmem:[#allocation3 + $0x750] ss:$24 sps:$4 sm:$0xff]  }
  0x59   :  { %1915 = vmatprep.subr.bf16.mxu0 %v2715_v37  ;;  %v2806_v36 = vld [vmem:[#allocation3 + $0x158] ss:$24 sps:$4 sm:$0xff]   ;;  %v2811_v37 = vld [vmem:[#allocation3 + $0x784] ss:$24 sps:$4 sm:$0xff]  }
  0x5b   :  { %1873 = vmatpush1.bf16.msra.mxu1 %v2717_v38  ;;  %v2814_v38 = vld [vmem:[#allocation3 + $0x18c] ss:$24 sps:$4 sm:$0xff]  }
  0x5c   :  { %1916 = vmatpush1.bf16.msra.mxu0 %v2718_v39  ;;  %1874 = vmatprep.subr.bf16.mxu1 %v2719_v40  ;;  %v2809_v39 = vld [vmem:[#allocation3 + $0x780] ss:$24 sps:$4 sm:$0xff]  }
  0x5d   :  { %1917 = vmatprep.subr.bf16.mxu0 %v2721_v41  ;;  %v2812_v40 = vld [vmem:[#allocation3 + $0x188] ss:$24 sps:$4 sm:$0xff]   ;;  %v2817_v41 = vld [vmem:[#allocation3 + $0x7b4] ss:$24 sps:$4 sm:$0xff]  }
  0x5f   :  { %1875 = vmatpush1.bf16.msra.mxu1 %v2723_v42  ;;  %v2820_v42 = vld [vmem:[#allocation3 + $0x1bc] ss:$24 sps:$4 sm:$0xff]  }
  0x60   :  { %1918 = vmatpush1.bf16.msra.mxu0 %v2724_v43  ;;  %1876 = vmatprep.subr.bf16.mxu1 %v2725_v44  ;;  %v2815_v43 = vld [vmem:[#allocation3 + $0x7b0] ss:$24 sps:$4 sm:$0xff]  }
  0x61   :  { %1919 = vmatprep.subr.bf16.mxu0 %v2727_v45  ;;  %v2818_v44 = vld [vmem:[#allocation3 + $0x1b8] ss:$24 sps:$4 sm:$0xff]   ;;  %v2823_v45 = vld [vmem:[#allocation3 + $0x7e4] ss:$24 sps:$4 sm:$0xff]  }
  0x63   :  { %1877 = vmatpush1.bf16.msra.mxu1 %v2729_v46  ;;  %v2826_v46 = vld [vmem:[#allocation3 + $0x1ec] ss:$24 sps:$4 sm:$0xff]  }
  0x64   :  { %1920 = vmatpush1.bf16.msra.mxu0 %v2730_v47  ;;  %1878 = vmatprep.subr.bf16.mxu1 %v2731_v50  ;;  %v2821_v47 = vld [vmem:[#allocation3 + $0x7e0] ss:$24 sps:$4 sm:$0xff]  }
  0x65   :  { %1921 = vmatprep.subr.bf16.mxu0 %v2733_v51  ;;  %v2824_v50 = vld [vmem:[#allocation3 + $0x1e8] ss:$24 sps:$4 sm:$0xff]   ;;  %v2829_v51 = vld [vmem:[#allocation3 + $0x814] ss:$24 sps:$4 sm:$0xff]  }
  0x67   :  { %1879 = vmatpush1.bf16.msra.mxu1 %v2735_v52  ;;  %v2832_v52 = vld [vmem:[#allocation3 + $0x21c] ss:$24 sps:$4 sm:$0xff]  }
  0x68   :  { %1922 = vmatpush1.bf16.msra.mxu0 %v2736_v53  ;;  %1880 = vmatprep.subr.bf16.mxu1 %v2737_v54  ;;  %v2827_v53 = vld [vmem:[#allocation3 + $0x810] ss:$24 sps:$4 sm:$0xff]  }
  0x69   :  { %1923 = vmatprep.subr.bf16.mxu0 %v2739_v55  ;;  %v2830_v54 = vld [vmem:[#allocation3 + $0x218] ss:$24 sps:$4 sm:$0xff]   ;;  %v2835_v55 = vld [vmem:[#allocation3 + $0x844] ss:$24 sps:$4 sm:$0xff]  }
  0x6b   :  { %1881 = vmatpush1.bf16.msra.mxu1 %v2741_v56  ;;  %v2838_v56 = vld [vmem:[#allocation3 + $0x24c] ss:$24 sps:$4 sm:$0xff]  }
  0x6c   :  { %1924 = vmatpush1.bf16.msra.mxu0 %v2742_v57  ;;  %1882 = vmatprep.subr.bf16.mxu1 %v2743_v58  ;;  %v2833_v57 = vld [vmem:[#allocation3 + $0x840] ss:$24 sps:$4 sm:$0xff]  }
  0x6d   :  { %1925 = vmatprep.subr.bf16.mxu0 %v2745_v59  ;;  %v2836_v58 = vld [vmem:[#allocation3 + $0x248] ss:$24 sps:$4 sm:$0xff]   ;;  %v2841_v59 = vld [vmem:[#allocation3 + $0x874] ss:$24 sps:$4 sm:$0xff]  }
  0x6f   :  { %1883 = vmatpush1.bf16.msra.mxu1 %v2747_v60  ;;  %v2844_v60 = vld [vmem:[#allocation3 + $0x27c] ss:$24 sps:$4 sm:$0xff]  }
  0x70   :  { %1926 = vmatpush1.bf16.msra.mxu0 %v2748_v61  ;;  %1884 = vmatprep.subr.bf16.mxu1 %v2749_v62  ;;  %v2839_v61 = vld [vmem:[#allocation3 + $0x870] ss:$24 sps:$4 sm:$0xff]  }
  0x71   :  { %1927 = vmatprep.subr.bf16.mxu0 %v2751_v63  ;;  %v2842_v62 = vld [vmem:[#allocation3 + $0x278] ss:$24 sps:$4 sm:$0xff]   ;;  %v2847_v63 = vld [vmem:[#allocation3 + $0x8a4] ss:$24 sps:$4 sm:$0xff]  }
  0x73   :  { %1885 = vmatpush1.bf16.msra.mxu1 %v2753_v0  ;;  %v2850_v0 = vld [vmem:[#allocation3 + $0x2ac] ss:$24 sps:$4 sm:$0xff]  }
  0x74   :  { %1928 = vmatpush1.bf16.msra.mxu0 %v2754_v1  ;;  %1983 = vmatprep.subr.bf16.mxu1 %v2764_v3  ;;  %v2845_v1 = vld [vmem:[#allocation3 + $0x8a0] ss:$24 sps:$4 sm:$0xff]   ;;  %v2853_v3 = vld [vmem:[#allocation3 + $0x8d4] ss:$24 sps:$4 sm:$0xff]  }
  0x75   :  { %1940 = vmatprep.subr.bf16.mxu0 %v2761_v2  ;;  %v2848_v2 = vld [vmem:[#allocation3 + $0x2a8] ss:$24 sps:$4 sm:$0xff]  }
  0x76   :  { %1887 = vmatmul.mubr.bf16.vlgmr.msra.gmra.mrb[0].mxu1 %v3289_v6 }
  0x77   :  { %1930 = vmatmul.mubr.bf16.vlgmr.msra.gmra.mrb[0].mxu0 %v3294_v7  ;;  %1984 = vmatpush1.bf16.msra.mxu1 %v2762_v5  ;;  %v2851_v5 = vld [vmem:[#allocation3 + $0x8d0] ss:$24 sps:$4 sm:$0xff]  }
  0x78   :  { %1941 = vmatpush1.bf16.msra.mxu0 %v2759_v4  ;;  %1985 = vmatprep.subr.bf16.mxu1 %v2772_v9  ;;  %v2856_v4 = vld [vmem:[#allocation3 + $0x2dc] ss:$24 sps:$4 sm:$0xff]   ;;  %v2862_v9 = vld [vmem:[#allocation3 + $0x30c] ss:$24 sps:$4 sm:$0xff]  }
  0x79   :  { %1942 = vmatprep.subr.bf16.mxu0 %v2769_v8  ;;  %2015 = vmatprep.mubr.bf16.mxu1 %v3277_v48  ;;  %v2854_v8 = vld [vmem:[#allocation3 + $0x2d8] ss:$24 sps:$4 sm:$0xff]  }
  0x7a   :  { %1972 = vmatprep.mubr.bf16.mxu0 %v3302_v34 }
  0x7b   :  { %1986 = vmatpush1.bf16.msra.mxu1 %v2770_v11  ;;  %v3308_v11 = vld [vmem:[%s3352_s1 + $0x10] ss:$24 sps:$4 sm:$0xff]  }
  0x7c   :  { %1943 = vmatpush1.bf16.msra.mxu0 %v2767_v10  ;;  %1987 = vmatprep.subr.bf16.mxu1 %v2778_v13  ;;  %v2865_v10 = vld [vmem:[#allocation3 + $0x14] ss:$24 sps:$4 sm:$0xff]   ;;  %v2863_v13 = vld [vmem:[#allocation3 + $0x10] ss:$24 sps:$4 sm:$0xff]  }
  0x7d   :  { %1944 = vmatprep.subr.bf16.mxu0 %v2775_v12  ;;  %v2860_v12 = vld [vmem:[#allocation3 + $0x308] ss:$24 sps:$4 sm:$0xff]  }
  0x7f   :  { %1988 = vmatpush1.bf16.msra.mxu1 %v2776_v15  ;;  %v2871_v15 = vld [vmem:[#allocation3 + $0x44] ss:$24 sps:$4 sm:$0xff]  }
  0x80   :  { %1945 = vmatpush1.bf16.msra.mxu0 %v2773_v14  ;;  %1989 = vmatprep.subr.bf16.mxu1 %v2784_v17  ;;  %v2868_v14 = vld [vmem:[#allocation3 + $0x33c] ss:$24 sps:$4 sm:$0xff]   ;;  %v2869_v17 = vld [vmem:[#allocation3 + $0x40] ss:$24 sps:$4 sm:$0xff]  }
  0x81   :  { %1946 = vmatprep.subr.bf16.mxu0 %v2781_v16  ;;  %v2866_v16 = vld [vmem:[#allocation3 + $0x338] ss:$24 sps:$4 sm:$0xff]  }
  0x83   :  { %1990 = vmatpush1.bf16.msra.mxu1 %v2782_v19  ;;  %v2877_v19 = vld [vmem:[#allocation3 + $0x74] ss:$24 sps:$4 sm:$0xff]  }
  0x84   :  { %1947 = vmatpush1.bf16.msra.mxu0 %v2779_v18  ;;  %1991 = vmatprep.subr.bf16.mxu1 %v2790_v21  ;;  %v2874_v18 = vld [vmem:[#allocation3 + $0x36c] ss:$24 sps:$4 sm:$0xff]   ;;  %v2875_v21 = vld [vmem:[#allocation3 + $0x70] ss:$24 sps:$4 sm:$0xff]  }
  0x85   :  { %1948 = vmatprep.subr.bf16.mxu0 %v2787_v20  ;;  %v2872_v20 = vld [vmem:[#allocation3 + $0x368] ss:$24 sps:$4 sm:$0xff]  }
  0x87   :  { %1992 = vmatpush1.bf16.msra.mxu1 %v2788_v23  ;;  %v2883_v23 = vld [vmem:[#allocation3 + $0xa4] ss:$24 sps:$4 sm:$0xff]  }
  0x88   :  { %1949 = vmatpush1.bf16.msra.mxu0 %v2785_v22  ;;  %1993 = vmatprep.subr.bf16.mxu1 %v2796_v25  ;;  %v2880_v22 = vld [vmem:[#allocation3 + $0x39c] ss:$24 sps:$4 sm:$0xff]   ;;  %v2881_v25 = vld [vmem:[#allocation3 + $0xa0] ss:$24 sps:$4 sm:$0xff]  }
  0x89   :  { %1950 = vmatprep.subr.bf16.mxu0 %v2793_v24  ;;  %v2878_v24 = vld [vmem:[#allocation3 + $0x398] ss:$24 sps:$4 sm:$0xff]  }
  0x8b   :  { %1994 = vmatpush1.bf16.msra.mxu1 %v2794_v27  ;;  %v2889_v27 = vld [vmem:[#allocation3 + $0xd4] ss:$24 sps:$4 sm:$0xff]  }
  0x8c   :  { %1951 = vmatpush1.bf16.msra.mxu0 %v2791_v26  ;;  %1995 = vmatprep.subr.bf16.mxu1 %v2802_v29  ;;  %v2886_v26 = vld [vmem:[#allocation3 + $0x3cc] ss:$24 sps:$4 sm:$0xff]  }
  0x8d   :  { %1952 = vmatprep.subr.bf16.mxu0 %v2799_v28  ;;  %v2884_v28 = vld [vmem:[#allocation3 + $0x3c8] ss:$24 sps:$4 sm:$0xff]   ;;  %v2895_v29 = vld [vmem:[#allocation3 + $0x104] ss:$24 sps:$4 sm:$0xff]  }
  0x8f   :  { %1996 = vmatpush1.bf16.msra.mxu1 %v2800_v31  ;;  %v2893_v31 = vld [vmem:[#allocation3 + $0x100] ss:$24 sps:$4 sm:$0xff]  }
  0x90   :  { %1953 = vmatpush1.bf16.msra.mxu0 %v2797_v30  ;;  %1997 = vmatprep.subr.bf16.mxu1 %v2808_v33  ;;  %v2890_v30 = vld [vmem:[#allocation3 + $0x3f8] ss:$24 sps:$4 sm:$0xff]   ;;  %v2901_v33 = vld [vmem:[#allocation3 + $0x134] ss:$24 sps:$4 sm:$0xff]  }
  0x91   :  { %1954 = vmatprep.subr.bf16.mxu0 %v2805_v32  ;;  %v2898_v32 = vld [vmem:[#allocation3 + $0x42c] ss:$24 sps:$4 sm:$0xff]  }
  0x93   :  { %1998 = vmatpush1.bf16.msra.mxu1 %v2806_v36  ;;  %v2899_v36 = vld [vmem:[#allocation3 + $0x130] ss:$24 sps:$4 sm:$0xff]  }
  0x94   :  { %1955 = vmatpush1.bf16.msra.mxu0 %v2803_v35  ;;  %1999 = vmatprep.subr.bf16.mxu1 %v2814_v38  ;;  %v2896_v35 = vld [vmem:[#allocation3 + $0x428] ss:$24 sps:$4 sm:$0xff]   ;;  %v2907_v38 = vld [vmem:[#allocation3 + $0x164] ss:$24 sps:$4 sm:$0xff]  }
  0x95   :  { %1956 = vmatprep.subr.bf16.mxu0 %v2811_v37  ;;  %v2904_v37 = vld [vmem:[#allocation3 + $0x45c] ss:$24 sps:$4 sm:$0xff]  }
  0x97   :  { %2000 = vmatpush1.bf16.msra.mxu1 %v2812_v40  ;;  %v2905_v40 = vld [vmem:[#allocation3 + $0x160] ss:$24 sps:$4 sm:$0xff]  }
  0x98   :  { %1957 = vmatpush1.bf16.msra.mxu0 %v2809_v39  ;;  %2001 = vmatprep.subr.bf16.mxu1 %v2820_v42  ;;  %v2902_v39 = vld [vmem:[#allocation3 + $0x458] ss:$24 sps:$4 sm:$0xff]   ;;  %v2913_v42 = vld [vmem:[#allocation3 + $0x194] ss:$24 sps:$4 sm:$0xff]  }
  0x99   :  { %1958 = vmatprep.subr.bf16.mxu0 %v2817_v41  ;;  %v2910_v41 = vld [vmem:[#allocation3 + $0x48c] ss:$24 sps:$4 sm:$0xff]  }
  0x9b   :  { %2002 = vmatpush1.bf16.msra.mxu1 %v2818_v44  ;;  %v2911_v44 = vld [vmem:[#allocation3 + $0x190] ss:$24 sps:$4 sm:$0xff]  }
  0x9c   :  { %1959 = vmatpush1.bf16.msra.mxu0 %v2815_v43  ;;  %2003 = vmatprep.subr.bf16.mxu1 %v2826_v46  ;;  %v2908_v43 = vld [vmem:[#allocation3 + $0x488] ss:$24 sps:$4 sm:$0xff]   ;;  %v2919_v46 = vld [vmem:[#allocation3 + $0x1c4] ss:$24 sps:$4 sm:$0xff]  }
  0x9d   :  { %1960 = vmatprep.subr.bf16.mxu0 %v2823_v45  ;;  %v2916_v45 = vld [vmem:[#allocation3 + $0x4bc] ss:$24 sps:$4 sm:$0xff]  }
  0x9f   :  { %2004 = vmatpush1.bf16.msra.mxu1 %v2824_v50  ;;  %v2917_v50 = vld [vmem:[#allocation3 + $0x1c0] ss:$24 sps:$4 sm:$0xff]  }
  0xa0   :  { %1961 = vmatpush1.bf16.msra.mxu0 %v2821_v47  ;;  %2005 = vmatprep.subr.bf16.mxu1 %v2832_v52  ;;  %v2914_v47 = vld [vmem:[#allocation3 + $0x4b8] ss:$24 sps:$4 sm:$0xff]   ;;  %v2925_v52 = vld [vmem:[#allocation3 + $0x1f4] ss:$24 sps:$4 sm:$0xff]  }
  0xa1   :  { %1962 = vmatprep.subr.bf16.mxu0 %v2829_v51  ;;  %v2922_v51 = vld [vmem:[#allocation3 + $0x4ec] ss:$24 sps:$4 sm:$0xff]  }
  0xa3   :  { %2006 = vmatpush1.bf16.msra.mxu1 %v2830_v54  ;;  %v2923_v54 = vld [vmem:[#allocation3 + $0x1f0] ss:$24 sps:$4 sm:$0xff]  }
  0xa4   :  { %1963 = vmatpush1.bf16.msra.mxu0 %v2827_v53  ;;  %2007 = vmatprep.subr.bf16.mxu1 %v2838_v56  ;;  %v2920_v53 = vld [vmem:[#allocation3 + $0x4e8] ss:$24 sps:$4 sm:$0xff]   ;;  %v2931_v56 = vld [vmem:[#allocation3 + $0x224] ss:$24 sps:$4 sm:$0xff]  }
  0xa5   :  { %1964 = vmatprep.subr.bf16.mxu0 %v2835_v55  ;;  %v2928_v55 = vld [vmem:[#allocation3 + $0x51c] ss:$24 sps:$4 sm:$0xff]  }
  0xa7   :  { %2008 = vmatpush1.bf16.msra.mxu1 %v2836_v58  ;;  %v2929_v58 = vld [vmem:[#allocation3 + $0x220] ss:$24 sps:$4 sm:$0xff]  }
  0xa8   :  { %1965 = vmatpush1.bf16.msra.mxu0 %v2833_v57  ;;  %2009 = vmatprep.subr.bf16.mxu1 %v2844_v60  ;;  %v2926_v57 = vld [vmem:[#allocation3 + $0x518] ss:$24 sps:$4 sm:$0xff]   ;;  %v2937_v60 = vld [vmem:[#allocation3 + $0x254] ss:$24 sps:$4 sm:$0xff]  }
  0xa9   :  { %1966 = vmatprep.subr.bf16.mxu0 %v2841_v59  ;;  %v2934_v59 = vld [vmem:[#allocation3 + $0x54c] ss:$24 sps:$4 sm:$0xff]  }
  0xab   :  { %2010 = vmatpush1.bf16.msra.mxu1 %v2842_v62  ;;  %v2935_v62 = vld [vmem:[#allocation3 + $0x250] ss:$24 sps:$4 sm:$0xff]  }
  0xac   :  { %1967 = vmatpush1.bf16.msra.mxu0 %v2839_v61  ;;  %2011 = vmatprep.subr.bf16.mxu1 %v2850_v0  ;;  %v2932_v61 = vld [vmem:[#allocation3 + $0x548] ss:$24 sps:$4 sm:$0xff]   ;;  %v2943_v0 = vld [vmem:[#allocation3 + $0x284] ss:$24 sps:$4 sm:$0xff]  }
  0xad   :  { %1968 = vmatprep.subr.bf16.mxu0 %v2847_v63  ;;  %v2940_v63 = vld [vmem:[#allocation3 + $0x57c] ss:$24 sps:$4 sm:$0xff]  }
  0xaf   :  { %2012 = vmatpush1.bf16.msra.mxu1 %v2848_v2  ;;  %v2941_v2 = vld [vmem:[#allocation3 + $0x280] ss:$24 sps:$4 sm:$0xff]  }
  0xb0   :  { %1969 = vmatpush1.bf16.msra.mxu0 %v2845_v1  ;;  %2013 = vmatprep.subr.bf16.mxu1 %v2856_v4  ;;  %v2938_v1 = vld [vmem:[#allocation3 + $0x578] ss:$24 sps:$4 sm:$0xff]   ;;  %v2949_v4 = vld [vmem:[#allocation3 + $0x2b4] ss:$24 sps:$4 sm:$0xff]  }
  0xb1   :  { %1970 = vmatprep.subr.bf16.mxu0 %v2853_v3  ;;  %v2946_v3 = vld [vmem:[#allocation3 + $0x5ac] ss:$24 sps:$4 sm:$0xff]  }
  0xb3   :  { %2014 = vmatpush1.bf16.msra.mxu1 %v2854_v8  ;;  %v2947_v8 = vld [vmem:[#allocation3 + $0x2b0] ss:$24 sps:$4 sm:$0xff]  }
  0xb4   :  { %1971 = vmatpush1.bf16.msra.mxu0 %v2851_v5  ;;  %2026 = vmatprep.subr.bf16.mxu1 %v2862_v9  ;;  %v2944_v5 = vld [vmem:[#allocation3 + $0x5a8] ss:$24 sps:$4 sm:$0xff]   ;;  %v2952_v9 = vld [vmem:[#allocation3 + $0x5dc] ss:$24 sps:$4 sm:$0xff]  }
  0xb5   :  { %2112 = vmatprep.subr.bf16.mxu0 %v2865_v10  ;;  %v2955_v10 = vld [vmem:[#allocation3 + $0x2e4] ss:$24 sps:$4 sm:$0xff]  }
  0xb6   :  { %2016 = vmatmul.mubr.bf16.vlgmr.msra.gmra.mrb[4].mxu1 %v3289_v6 }
  0xb7   :  { %1973 = vmatmul.mubr.bf16.vlgmr.msra.gmra.mrb[0].mxu0 %v3308_v11  ;;  %2027 = vmatpush1.bf16.msra.mxu1 %v2860_v12  ;;  %v2950_v12 = vld [vmem:[#allocation3 + $0x5d8] ss:$24 sps:$4 sm:$0xff]  }
  0xb8   :  { %2113 = vmatpush1.bf16.msra.mxu0 %v2863_v13  ;;  %2028 = vmatprep.subr.bf16.mxu1 %v2868_v14  ;;  %v2953_v13 = vld [vmem:[#allocation3 + $0x2e0] ss:$24 sps:$4 sm:$0xff]   ;;  %v2958_v14 = vld [vmem:[#allocation3 + $0x60c] ss:$24 sps:$4 sm:$0xff]  }
  0xb9   :  { %2114 = vmatprep.subr.bf16.mxu0 %v2871_v15  ;;  %2058 = vmatprep.mubr.bf16.mxu1 %v3282_v49  ;;  %v2887_v49 = vld [vmem:[#allocation3 + $0xd0] ss:$24 sps:$4 sm:$0xff]   ;;  %v2961_v15 = vld [vmem:[#allocation3 + $0x314] ss:$24 sps:$4 sm:$0xff]  }
  0xba   :  { %2144 = vmatprep.mubr.bf16.mxu0 %v3277_v48  ;;  %v2892_v48 = vld [vmem:[#allocation3 + $0x3fc] ss:$24 sps:$4 sm:$0xff]  }
  0xbb   :  { %2029 = vmatpush1.bf16.msra.mxu1 %v2866_v16  ;;  %v2956_v16 = vld [vmem:[#allocation3 + $0x608] ss:$24 sps:$4 sm:$0xff]  }
  0xbc   :  { %2115 = vmatpush1.bf16.msra.mxu0 %v2869_v17  ;;  %2030 = vmatprep.subr.bf16.mxu1 %v2874_v18  ;;  %v2959_v17 = vld [vmem:[#allocation3 + $0x310] ss:$24 sps:$4 sm:$0xff]   ;;  %v2964_v18 = vld [vmem:[#allocation3 + $0x63c] ss:$24 sps:$4 sm:$0xff]  }
  0xbd   :  { %2116 = vmatprep.subr.bf16.mxu0 %v2877_v19  ;;  %v2967_v19 = vld [vmem:[#allocation3 + $0x344] ss:$24 sps:$4 sm:$0xff]  }
  0xbf   :  { %2031 = vmatpush1.bf16.msra.mxu1 %v2872_v20  ;;  %v2962_v20 = vld [vmem:[#allocation3 + $0x638] ss:$24 sps:$4 sm:$0xff]  }
  0xc0   :  { %2117 = vmatpush1.bf16.msra.mxu0 %v2875_v21  ;;  %2032 = vmatprep.subr.bf16.mxu1 %v2880_v22  ;;  %v2965_v21 = vld [vmem:[#allocation3 + $0x340] ss:$24 sps:$4 sm:$0xff]   ;;  %v2970_v22 = vld [vmem:[#allocation3 + $0x66c] ss:$24 sps:$4 sm:$0xff]  }
  0xc1   :  { %2118 = vmatprep.subr.bf16.mxu0 %v2883_v23  ;;  %v2973_v23 = vld [vmem:[#allocation3 + $0x374] ss:$24 sps:$4 sm:$0xff]  }
  0xc3   :  { %2033 = vmatpush1.bf16.msra.mxu1 %v2878_v24  ;;  %v3124_v24 = vld [vmem:[%s3352_s1 + $0xc] ss:$24 sps:$4 sm:$0xff]  }
  0xc4   :  { %2119 = vmatpush1.bf16.msra.mxu0 %v2881_v25  ;;  %2034 = vmatprep.subr.bf16.mxu1 %v2886_v26  ;;  %v2971_v25 = vld [vmem:[#allocation3 + $0x370] ss:$24 sps:$4 sm:$0xff]   ;;  %v2979_v26 = vld [vmem:[#allocation3 + $0x3a4] ss:$24 sps:$4 sm:$0xff]  }
  0xc5   :  { %2120 = vmatprep.subr.bf16.mxu0 %v2889_v27  ;;  %v2974_v27 = vld [vmem:[#allocation3 + $0x698] ss:$24 sps:$4 sm:$0xff]  }
  0xc7   :  { %2035 = vmatpush1.bf16.msra.mxu1 %v2884_v28  ;;  %v2977_v28 = vld [vmem:[#allocation3 + $0x3a0] ss:$24 sps:$4 sm:$0xff]  }
  0xc8   :  { %2121 = vmatpush1.bf16.msra.mxu0 %v2887_v49  ;;  %2036 = vmatprep.subr.bf16.mxu1 %v2892_v48  ;;  %v2982_v49 = vld [vmem:[#allocation3 + $0x6cc] ss:$24 sps:$4 sm:$0xff]  }
  0xc9   :  { %2122 = vmatprep.subr.bf16.mxu0 %v2895_v29  ;;  %v2985_v48 = vld [vmem:[#allocation3 + $0x3d4] ss:$24 sps:$4 sm:$0xff]   ;;  %v2980_v29 = vld [vmem:[#allocation3 + $0x6c8] ss:$24 sps:$4 sm:$0xff]  }
  0xcb   :  { %2037 = vmatpush1.bf16.msra.mxu1 %v2890_v30  ;;  %v2983_v30 = vld [vmem:[#allocation3 + $0x3d0] ss:$24 sps:$4 sm:$0xff]  }
  0xcc   :  { %2123 = vmatpush1.bf16.msra.mxu0 %v2893_v31  ;;  %2038 = vmatprep.subr.bf16.mxu1 %v2898_v32  ;;  %v2988_v31 = vld [vmem:[#allocation3 + $0x6fc] ss:$24 sps:$4 sm:$0xff]  }
  0xcd   :  { %2124 = vmatprep.subr.bf16.mxu0 %v2901_v33  ;;  %v2991_v32 = vld [vmem:[#allocation3 + $0x404] ss:$24 sps:$4 sm:$0xff]   ;;  %v2986_v33 = vld [vmem:[#allocation3 + $0x6f8] ss:$24 sps:$4 sm:$0xff]  }
  0xcf   :  { %2039 = vmatpush1.bf16.msra.mxu1 %v2896_v35  ;;  %v2989_v35 = vld [vmem:[#allocation3 + $0x400] ss:$24 sps:$4 sm:$0xff]  }
  0xd0   :  { %2125 = vmatpush1.bf16.msra.mxu0 %v2899_v36  ;;  %2040 = vmatprep.subr.bf16.mxu1 %v2904_v37  ;;  %v2994_v36 = vld [vmem:[#allocation3 + $0x72c] ss:$24 sps:$4 sm:$0xff]  }
  0xd1   :  { %2126 = vmatprep.subr.bf16.mxu0 %v2907_v38  ;;  %v2997_v37 = vld [vmem:[#allocation3 + $0x434] ss:$24 sps:$4 sm:$0xff]   ;;  %v2992_v38 = vld [vmem:[#allocation3 + $0x728] ss:$24 sps:$4 sm:$0xff]  }
  0xd3   :  { %2041 = vmatpush1.bf16.msra.mxu1 %v2902_v39  ;;  %v2995_v39 = vld [vmem:[#allocation3 + $0x430] ss:$24 sps:$4 sm:$0xff]  }
  0xd4   :  { %2127 = vmatpush1.bf16.msra.mxu0 %v2905_v40  ;;  %2042 = vmatprep.subr.bf16.mxu1 %v2910_v41  ;;  %v3000_v40 = vld [vmem:[#allocation3 + $0x75c] ss:$24 sps:$4 sm:$0xff]  }
  0xd5   :  { %2128 = vmatprep.subr.bf16.mxu0 %v2913_v42  ;;  %v3003_v41 = vld [vmem:[#allocation3 + $0x464] ss:$24 sps:$4 sm:$0xff]   ;;  %v2998_v42 = vld [vmem:[#allocation3 + $0x758] ss:$24 sps:$4 sm:$0xff]  }
  0xd7   :  { %2043 = vmatpush1.bf16.msra.mxu1 %v2908_v43  ;;  %v3001_v43 = vld [vmem:[#allocation3 + $0x460] ss:$24 sps:$4 sm:$0xff]  }
  0xd8   :  { %2129 = vmatpush1.bf16.msra.mxu0 %v2911_v44  ;;  %2044 = vmatprep.subr.bf16.mxu1 %v2916_v45  ;;  %v3006_v44 = vld [vmem:[#allocation3 + $0x78c] ss:$24 sps:$4 sm:$0xff]  }
  0xd9   :  { %2130 = vmatprep.subr.bf16.mxu0 %v2919_v46  ;;  %v3009_v45 = vld [vmem:[#allocation3 + $0x494] ss:$24 sps:$4 sm:$0xff]   ;;  %v3004_v46 = vld [vmem:[#allocation3 + $0x788] ss:$24 sps:$4 sm:$0xff]  }
  0xdb   :  { %2045 = vmatpush1.bf16.msra.mxu1 %v2914_v47  ;;  %v3007_v47 = vld [vmem:[#allocation3 + $0x490] ss:$24 sps:$4 sm:$0xff]  }
  0xdc   :  { %2131 = vmatpush1.bf16.msra.mxu0 %v2917_v50  ;;  %2046 = vmatprep.subr.bf16.mxu1 %v2922_v51  ;;  %v3012_v50 = vld [vmem:[#allocation3 + $0x7bc] ss:$24 sps:$4 sm:$0xff]  }
  0xdd   :  { %2132 = vmatprep.subr.bf16.mxu0 %v2925_v52  ;;  %v3015_v51 = vld [vmem:[#allocation3 + $0x4c4] ss:$24 sps:$4 sm:$0xff]   ;;  %v3010_v52 = vld [vmem:[#allocation3 + $0x7b8] ss:$24 sps:$4 sm:$0xff]  }
  0xdf   :  { %2047 = vmatpush1.bf16.msra.mxu1 %v2920_v53  ;;  %v3013_v53 = vld [vmem:[#allocation3 + $0x4c0] ss:$24 sps:$4 sm:$0xff]  }
  0xe0   :  { %2133 = vmatpush1.bf16.msra.mxu0 %v2923_v54  ;;  %2048 = vmatprep.subr.bf16.mxu1 %v2928_v55  ;;  %v3018_v54 = vld [vmem:[#allocation3 + $0x7ec] ss:$24 sps:$4 sm:$0xff]  }
  0xe1   :  { %2134 = vmatprep.subr.bf16.mxu0 %v2931_v56  ;;  %v3021_v55 = vld [vmem:[#allocation3 + $0x4f4] ss:$24 sps:$4 sm:$0xff]   ;;  %v3016_v56 = vld [vmem:[#allocation3 + $0x7e8] ss:$24 sps:$4 sm:$0xff]  }
  0xe3   :  { %2049 = vmatpush1.bf16.msra.mxu1 %v2926_v57  ;;  %v3019_v57 = vld [vmem:[#allocation3 + $0x4f0] ss:$24 sps:$4 sm:$0xff]  }
  0xe4   :  { %2135 = vmatpush1.bf16.msra.mxu0 %v2929_v58  ;;  %2050 = vmatprep.subr.bf16.mxu1 %v2934_v59  ;;  %v3024_v58 = vld [vmem:[#allocation3 + $0x81c] ss:$24 sps:$4 sm:$0xff]  }
  0xe5   :  { %2136 = vmatprep.subr.bf16.mxu0 %v2937_v60  ;;  %v3027_v59 = vld [vmem:[#allocation3 + $0x524] ss:$24 sps:$4 sm:$0xff]   ;;  %v3022_v60 = vld [vmem:[#allocation3 + $0x818] ss:$24 sps:$4 sm:$0xff]  }
  0xe7   :  { %2051 = vmatpush1.bf16.msra.mxu1 %v2932_v61  ;;  %v3025_v61 = vld [vmem:[#allocation3 + $0x520] ss:$24 sps:$4 sm:$0xff]  }
  0xe8   :  { %2137 = vmatpush1.bf16.msra.mxu0 %v2935_v62  ;;  %2052 = vmatprep.subr.bf16.mxu1 %v2940_v63  ;;  %v3030_v62 = vld [vmem:[#allocation3 + $0x84c] ss:$24 sps:$4 sm:$0xff]  }
  0xe9   :  { %2138 = vmatprep.subr.bf16.mxu0 %v2943_v0  ;;  %v3033_v63 = vld [vmem:[#allocation3 + $0x554] ss:$24 sps:$4 sm:$0xff]   ;;  %v3028_v0 = vld [vmem:[#allocation3 + $0x848] ss:$24 sps:$4 sm:$0xff]  }
  0xeb   :  { %2053 = vmatpush1.bf16.msra.mxu1 %v2938_v1  ;;  %v3031_v1 = vld [vmem:[#allocation3 + $0x550] ss:$24 sps:$4 sm:$0xff]  }
  0xec   :  { %2139 = vmatpush1.bf16.msra.mxu0 %v2941_v2  ;;  %2054 = vmatprep.subr.bf16.mxu1 %v2946_v3  ;;  %v3036_v2 = vld [vmem:[#allocation3 + $0x87c] ss:$24 sps:$4 sm:$0xff]  }
  0xed   :  { %2140 = vmatprep.subr.bf16.mxu0 %v2949_v4  ;;  %v3039_v3 = vld [vmem:[#allocation3 + $0x584] ss:$24 sps:$4 sm:$0xff]   ;;  %v3034_v4 = vld [vmem:[#allocation3 + $0x878] ss:$24 sps:$4 sm:$0xff]  }
  0xef   :  { %2055 = vmatpush1.bf16.msra.mxu1 %v2944_v5  ;;  %v3037_v5 = vld [vmem:[#allocation3 + $0x580] ss:$24 sps:$4 sm:$0xff]  }
  0xf0   :  { %2141 = vmatpush1.bf16.msra.mxu0 %v2947_v8  ;;  %2056 = vmatprep.subr.bf16.mxu1 %v2952_v9  ;;  %v3042_v8 = vld [vmem:[#allocation3 + $0x8ac] ss:$24 sps:$4 sm:$0xff]  }
  0xf1   :  { %2142 = vmatprep.subr.bf16.mxu0 %v2955_v10  ;;  %v3045_v9 = vld [vmem:[#allocation3 + $0x5b4] ss:$24 sps:$4 sm:$0xff]   ;;  %v3040_v10 = vld [vmem:[#allocation3 + $0x8a8] ss:$24 sps:$4 sm:$0xff]  }
  0xf3   :  { %2057 = vmatpush1.bf16.msra.mxu1 %v2950_v12  ;;  %v3043_v12 = vld [vmem:[#allocation3 + $0x5b0] ss:$24 sps:$4 sm:$0xff]  }
  0xf4   :  { %2143 = vmatpush1.bf16.msra.mxu0 %v2953_v13  ;;  %2069 = vmatprep.subr.bf16.mxu1 %v2958_v14  ;;  %v3048_v13 = vld [vmem:[#allocation3 + $0x8dc] ss:$24 sps:$4 sm:$0xff]  }
  0xf5   :  { %2155 = vmatprep.subr.bf16.mxu0 %v2961_v15  ;;  %v3051_v14 = vld [vmem:[#allocation3 + $0x5e4] ss:$24 sps:$4 sm:$0xff]   ;;  %v3046_v15 = vld [vmem:[#allocation3 + $0x8d8] ss:$24 sps:$4 sm:$0xff]  }
  0xf6   :  { %2059 = vmatmul.mubr.bf16.vlgmr.msra.gmra.mrb[4].mxu1 %v3294_v7  ;;  %v2968_v7 = vld [vmem:[#allocation3 + $0x668] ss:$24 sps:$4 sm:$0xff]  }
  0xf7   :  { %2145 = vmatmul.mubr.bf16.vlgmr.msra.gmra.mrb[4].mxu0 %v3289_v6  ;;  %2070 = vmatpush1.bf16.msra.mxu1 %v2956_v16  ;;  %v2976_v6 = vld [vmem:[#allocation3 + $0x69c] ss:$24 sps:$4 sm:$0xff]   ;;  %v3049_v16 = vld [vmem:[#allocation3 + $0x5e0] ss:$24 sps:$4 sm:$0xff]  }
  0xf8   :  { %2156 = vmatpush1.bf16.msra.mxu0 %v2959_v17  ;;  %2071 = vmatprep.subr.bf16.mxu1 %v2964_v18  ;;  %v3054_v17 = vld [vmem:[#allocation3 + $0x614] ss:$24 sps:$4 sm:$0xff]   ;;  %v3052_v18 = vld [vmem:[#allocation3 + $0x610] ss:$24 sps:$4 sm:$0xff]  }
  0xf9   :  { %2157 = vmatprep.subr.bf16.mxu0 %v2967_v19  ;;  %2101 = vmatprep.mubr.bf16.mxu1 %v3302_v34  ;;  %v3057_v19 = vld [vmem:[#allocation3 + $0x644] ss:$24 sps:$4 sm:$0xff]  }
  0xfa   :  { %2187 = vmatprep.mubr.bf16.mxu0 %v3124_v24  ;;  %v3063_v24 = vld [vmem:[#allocation3 + $0x6a4] ss:$24 sps:$4 sm:$0xff]  }
  0xfb   :  { %2072 = vmatpush1.bf16.msra.mxu1 %v2962_v20  ;;  %v3125_v20 = vld [vmem:[%s3352_s1 + $0x8] ss:$24 sps:$4 sm:$0xff]  }
  0xfc   :  { %2158 = vmatpush1.bf16.msra.mxu0 %v2965_v21  ;;  %2073 = vmatprep.subr.bf16.mxu1 %v2970_v22  ;;  %v3055_v21 = vld [vmem:[#allocation3 + $0x640] ss:$24 sps:$4 sm:$0xff]   ;;  %v3060_v22 = vld [vmem:[#allocation3 + $0x674] ss:$24 sps:$4 sm:$0xff]  }
  0xfd   :  { %2159 = vmatprep.subr.bf16.mxu0 %v2973_v23  ;;  %v3058_v23 = vld [vmem:[#allocation3 + $0x670] ss:$24 sps:$4 sm:$0xff]  }
  0xff   :  { %2074 = vmatpush1.bf16.msra.mxu1 %v2968_v7  ;;  %v3061_v7 = vld [vmem:[#allocation3 + $0x6a0] ss:$24 sps:$4 sm:$0xff]  }
 0x100   :  { %2160 = vmatpush1.bf16.msra.mxu0 %v2971_v25  ;;  %2075 = vmatprep.subr.bf16.mxu1 %v2976_v6  ;;  %v3066_v25 = vld [vmem:[#allocation3 + $0x6d4] ss:$24 sps:$4 sm:$0xff]   ;;  %v3064_v6 = vld [vmem:[#allocation3 + $0x6d0] ss:$24 sps:$4 sm:$0xff]  }
 0x101   :  { %2161 = vmatprep.subr.bf16.mxu0 %v2979_v26  ;;  %v3069_v26 = vld [vmem:[#allocation3 + $0x704] ss:$24 sps:$4 sm:$0xff]  }
 0x103   :  { %2076 = vmatpush1.bf16.msra.mxu1 %v2974_v27  ;;  %v3067_v27 = vld [vmem:[#allocation3 + $0x700] ss:$24 sps:$4 sm:$0xff]  }
 0x104   :  { %2162 = vmatpush1.bf16.msra.mxu0 %v2977_v28  ;;  %2077 = vmatprep.subr.bf16.mxu1 %v2982_v49  ;;  %v3072_v28 = vld [vmem:[#allocation3 + $0x734] ss:$24 sps:$4 sm:$0xff]  }
 0x105   :  { %2163 = vmatprep.subr.bf16.mxu0 %v2985_v48  ;;  %v3070_v48 = vld [vmem:[#allocation3 + $0x730] ss:$24 sps:$4 sm:$0xff]  }
 0x107   :  { %2078 = vmatpush1.bf16.msra.mxu1 %v2980_v29 }
 0x108   :  { %2164 = vmatpush1.bf16.msra.mxu0 %v2983_v30  ;;  %2079 = vmatprep.subr.bf16.mxu1 %v2988_v31  ;;  %v3075_v30 = vld [vmem:[#allocation3 + $0x764] ss:$24 sps:$4 sm:$0xff]  }
 0x109   :  { %2165 = vmatprep.subr.bf16.mxu0 %v2991_v32  ;;  %v3073_v32 = vld [vmem:[#allocation3 + $0x760] ss:$24 sps:$4 sm:$0xff]  }
 0x10b   :  { %2080 = vmatpush1.bf16.msra.mxu1 %v2986_v33  ;;  %v3078_v33 = vld [vmem:[#allocation3 + $0x794] ss:$24 sps:$4 sm:$0xff]  }
 0x10c   :  { %2166 = vmatpush1.bf16.msra.mxu0 %v2989_v35  ;;  %2081 = vmatprep.subr.bf16.mxu1 %v2994_v36  ;;  %v3076_v35 = vld [vmem:[#allocation3 + $0x790] ss:$24 sps:$4 sm:$0xff]   ;;  %v3081_v36 = vld [vmem:[#allocation3 + $0x7c4] ss:$24 sps:$4 sm:$0xff]  }
 0x10d   :  { %2167 = vmatprep.subr.bf16.mxu0 %v2997_v37  ;;  %v3079_v37 = vld [vmem:[#allocation3 + $0x7c0] ss:$24 sps:$4 sm:$0xff]  }
 0x10f   :  { %2082 = vmatpush1.bf16.msra.mxu1 %v2992_v38  ;;  %v3084_v38 = vld [vmem:[#allocation3 + $0x7f4] ss:$24 sps:$4 sm:$0xff]  }
 0x110   :  { %2168 = vmatpush1.bf16.msra.mxu0 %v2995_v39  ;;  %2083 = vmatprep.subr.bf16.mxu1 %v3000_v40  ;;  %v3082_v39 = vld [vmem:[#allocation3 + $0x7f0] ss:$24 sps:$4 sm:$0xff]   ;;  %v3087_v40 = vld [vmem:[#allocation3 + $0x824] ss:$24 sps:$4 sm:$0xff]  }
 0x111   :  { %2169 = vmatprep.subr.bf16.mxu0 %v3003_v41  ;;  %v3085_v41 = vld [vmem:[#allocation3 + $0x820] ss:$24 sps:$4 sm:$0xff]  }
 0x113   :  { %2084 = vmatpush1.bf16.msra.mxu1 %v2998_v42  ;;  %v3090_v42 = vld [vmem:[#allocation3 + $0x854] ss:$24 sps:$4 sm:$0xff]  }
 0x114   :  { %2170 = vmatpush1.bf16.msra.mxu0 %v3001_v43  ;;  %2085 = vmatprep.subr.bf16.mxu1 %v3006_v44  ;;  %v3088_v43 = vld [vmem:[#allocation3 + $0x850] ss:$24 sps:$4 sm:$0xff]   ;;  %v3093_v44 = vld [vmem:[#allocation3 + $0x884] ss:$24 sps:$4 sm:$0xff]  }
 0x115   :  { %2171 = vmatprep.subr.bf16.mxu0 %v3009_v45  ;;  %v3091_v45 = vld [vmem:[#allocation3 + $0x880] ss:$24 sps:$4 sm:$0xff]  }
 0x117   :  { %2086 = vmatpush1.bf16.msra.mxu1 %v3004_v46  ;;  %v3096_v46 = vld [vmem:[#allocation3 + $0x8b4] ss:$24 sps:$4 sm:$0xff]  }
 0x118   :  { %2172 = vmatpush1.bf16.msra.mxu0 %v3007_v47  ;;  %2087 = vmatprep.subr.bf16.mxu1 %v3012_v50  ;;  %v3094_v47 = vld [vmem:[#allocation3 + $0x8b0] ss:$24 sps:$4 sm:$0xff]   ;;  %v3099_v50 = vld [vmem:[#allocation3 + $0x8e4] ss:$24 sps:$4 sm:$0xff]  }
 0x119   :  { %2173 = vmatprep.subr.bf16.mxu0 %v3015_v51  ;;  %v3097_v51 = vld [vmem:[#allocation3 + $0x8e0] ss:$24 sps:$4 sm:$0xff]  }
 0x11b   :  { %2088 = vmatpush1.bf16.msra.mxu1 %v3010_v52  ;;  %v354_v52 = vlaneseq }
 0x11c   :  { %2174 = vmatpush1.bf16.msra.mxu0 %v3013_v53  ;;  %2089 = vmatprep.subr.bf16.mxu1 %v3018_v54 }
 0x11d   :  { %2175 = vmatprep.subr.bf16.mxu0 %v3021_v55  ;;  %v3326_v53 = vshrl.u32 %v354_v52, 7  ;;  %v3329_v55 = vld [vmem:[#allocation5] sm:$0x3f] }
 0x11f   :  { %2090 = vmatpush1.bf16.msra.mxu1 %v3016_v56  ;;  %v356_v54 = vsub.s32 0, %v3326_v53  ;;  %v360_v56 = vsub.s32 1, %v3326_v53 }
 0x120   :  { %2176 = vmatpush1.bf16.msra.mxu0 %v3019_v57  ;;  %2091 = vmatprep.subr.bf16.mxu1 %v3024_v58 }
 0x121   :  { %2177 = vmatprep.subr.bf16.mxu0 %v3027_v59  ;;  %v357_v57 = vrot.slane %v3329_v55, %v356_v54  ;;  %v361_v58 = vrot.slane %v3329_v55, %v360_v56 }
 0x123   :  { %2092 = vmatpush1.bf16.msra.mxu1 %v3022_v60 }
 0x124   :  { %2178 = vmatpush1.bf16.msra.mxu0 %v3025_v61  ;;  %2093 = vmatprep.subr.bf16.mxu1 %v3030_v62 }
 0x125   :  { %2179 = vmatprep.subr.bf16.mxu0 %v3033_v63 }
 0x127   :  { %2094 = vmatpush1.bf16.msra.mxu1 %v3028_v0 }
 0x128   :  { %2180 = vmatpush1.bf16.msra.mxu0 %v3031_v1  ;;  %2095 = vmatprep.subr.bf16.mxu1 %v3036_v2 }
 0x129   :  { %2181 = vmatprep.subr.bf16.mxu0 %v3039_v3 }
 0x12b   :  { %2096 = vmatpush1.bf16.msra.mxu1 %v3034_v4 }
 0x12c   :  { %2182 = vmatpush1.bf16.msra.mxu0 %v3037_v5  ;;  %2097 = vmatprep.subr.bf16.mxu1 %v3042_v8  ;;  %v2253_v8 = vld [vmem:[#allocation7] sm:$0x3f] }
 0x12d   :  { %2183 = vmatprep.subr.bf16.mxu0 %v3045_v9  ;;  %v2258_v9 = vrot.slane %v2253_v8, %v356_v54 }
 0x12f   :  { %2098 = vmatpush1.bf16.msra.mxu1 %v3040_v10  ;;  %v2262_v10 = vrot.slane %v2253_v8, %v360_v56 }
 0x130   :  { %2184 = vmatpush1.bf16.msra.mxu0 %v3043_v12  ;;  %2099 = vmatprep.subr.bf16.mxu1 %v3048_v13 }
 0x131   :  { %2185 = vmatprep.subr.bf16.mxu0 %v3051_v14 }
 0x133   :  { %2100 = vmatpush1.bf16.msra.mxu1 %v3046_v15 }
 0x134   :  { %2186 = vmatpush1.bf16.msra.mxu0 %v3049_v16 }
 0x135   :  { %2198 = vmatprep.subr.bf16.mxu0 %v3054_v17 }
 0x136   :  { %2102 = vmatmul.mubr.bf16.vlgmr.msra.gmra.mrb[4].mxu1 %v3308_v11 }
 0x137   :  { %2188 = vmatmul.mubr.bf16.vlgmr.msra.gmra.mrb[4].mxu0 %v3125_v20 }
 0x138   :  { %2199 = vmatpush1.bf16.msra.mxu0 %v3052_v18  ;;  %2230 = vmatprep.mubr.bf16.mxu0 %v3302_v34 }
 0x139   :  { %2200 = vmatprep.subr.bf16.mxu0 %v3057_v19 }
 0x13c   :  { %2201 = vmatpush1.bf16.msra.mxu0 %v3055_v21 }
 0x13d   :  { %2202 = vmatprep.subr.bf16.mxu0 %v3060_v22  ;;  %v364_v22 = vsub.s32 2, %v3326_v53 }
 0x140   :  { %2203 = vmatpush1.bf16.msra.mxu0 %v3058_v23  ;;  %v368_v23 = vsub.s32 3, %v3326_v53 }
 0x141   :  { %2204 = vmatprep.subr.bf16.mxu0 %v3063_v24  ;;  %v365_v24 = vrot.slane %v3329_v55, %v364_v22 }
 0x144   :  { %2205 = vmatpush1.bf16.msra.mxu0 %v3061_v7  ;;  %v369_v7 = vrot.slane %v3329_v55, %v368_v23 }
 0x145   :  { %2206 = vmatprep.subr.bf16.mxu0 %v3066_v25 }
 0x148   :  { %2207 = vmatpush1.bf16.msra.mxu0 %v3064_v6 }
 0x149   :  { %2208 = vmatprep.subr.bf16.mxu0 %v3069_v26  ;;  %v1888_v49 = vpop.f32.mrb[0].mxu1 }
 0x14a   :  { %v1890_v34 = vpop.f32.mrb[1].mxu1  ;;  %v1889_v59 = vadd.f32 %v1888_v49, %v357_v57 }
 0x14b   :  { %v1892_v29 = vpop.f32.mrb[2].mxu1  ;;  %v1891_v60 = vadd.f32 %v1890_v34, %v361_v58 }
 0x14c   :  { %2209 = vmatpush1.bf16.msra.mxu0 %v3067_v27  ;;  %v1894_v31 = vpop.f32.mrb[3].mxu1  ;;  %v1893_v62 = vadd.f32 %v1892_v29, %v357_v57  ;;  %v2266_v29 = vrot.slane %v2253_v8, %v364_v22 }
 0x14d   :  { %2210 = vmatprep.subr.bf16.mxu0 %v3072_v28 }
 0x150   :  { %2211 = vmatpush1.bf16.msra.mxu0 %v3070_v48 }
 0x151   :  { %2212 = vmatprep.subr.bf16.mxu0 %v3075_v30  ;;  %v2270_v30 = vrot.slane %v2253_v8, %v368_v23 }
 0x154   :  { %2213 = vmatpush1.bf16.msra.mxu0 %v3073_v32 }
 0x155   :  { %2214 = vmatprep.subr.bf16.mxu0 %v3078_v33 }
 0x158   :  { %2215 = vmatpush1.bf16.msra.mxu0 %v3076_v35 }
 0x159   :  { %2216 = vmatprep.subr.bf16.mxu0 %v3081_v36 }
 0x15c   :  { %2217 = vmatpush1.bf16.msra.mxu0 %v3079_v37 }
 0x15d   :  { %2218 = vmatprep.subr.bf16.mxu0 %v3084_v38 }
 0x160   :  { %2219 = vmatpush1.bf16.msra.mxu0 %v3082_v39 }
 0x161   :  { %2220 = vmatprep.subr.bf16.mxu0 %v3087_v40 }
 0x164   :  { %2221 = vmatpush1.bf16.msra.mxu0 %v3085_v41 }
 0x165   :  { %2222 = vmatprep.subr.bf16.mxu0 %v3090_v42 }
 0x168   :  { %2223 = vmatpush1.bf16.msra.mxu0 %v3088_v43 }
 0x169   :  { %2224 = vmatprep.subr.bf16.mxu0 %v3093_v44  ;;  %v372_v44 = vsub.s32 4, %v3326_v53 }
 0x16c   :  { %2225 = vmatpush1.bf16.msra.mxu0 %v3091_v45  ;;  %v376_v45 = vsub.s32 5, %v3326_v53 }
 0x16d   :  { %2226 = vmatprep.subr.bf16.mxu0 %v3096_v46  ;;  %v373_v46 = vrot.slane %v3329_v55, %v372_v44 }
 0x170   :  { %2227 = vmatpush1.bf16.msra.mxu0 %v3094_v47  ;;  %v377_v47 = vrot.slane %v3329_v55, %v376_v45 }
 0x171   :  { %2228 = vmatprep.subr.bf16.mxu0 %v3099_v50 }
 0x174   :  { %2229 = vmatpush1.bf16.msra.mxu0 %v3097_v51 }
 0x177   :  { %2231 = vmatmul.mubr.bf16.vlgmr.msra.gmra.mrb[4].mxu0 %v3308_v11  ;;  %v1895_v11 = vadd.f32 %v1894_v31, %v361_v58 }
 0x18a   :  { %v1974_v61 = vpop.f32.mrb[0].mxu0 }
 0x18b   :  { %v2619_v63 = vadd.f32 %v1974_v61, %v1889_v59  ;;  %v1976_v0 = vpop.f32.mrb[1].mxu0  ;;  %v2278_v61 = vrot.slane %v2253_v8, %v376_v45 }
 0x18c   :  { %v2621_v1 = vadd.f32 %v1976_v0, %v1891_v60  ;;  %v1978_v2 = vpop.f32.mrb[2].mxu0  ;;  %v2274_v60 = vrot.slane %v2253_v8, %v372_v44 }
 0x18d   :  { %3100 = vtanh.f32 %v2619_v63  ;;  %v2623_v3 = vadd.f32 %v1978_v2, %v1893_v62  ;;  %v1980_v4 = vpop.f32.mrb[3].mxu0 }
 0x18e   :  { %3102 = vtanh.f32 %v2621_v1  ;;  %v2625_v5 = vadd.f32 %v1980_v4, %v1895_v11 }
 0x18f   :  { %3104 = vtanh.f32 %v2623_v3 }
 0x190   :  { %3106 = vtanh.f32 %v2625_v5 }
 0x197   :  { %v3101_v12 = vpop.eup %3100 }
 0x198   :  { %v3103_v13 = vpop.eup %3102  ;;  %v2285_v14 = vmul.f32 %v3101_v12, %v2258_v9 }
 0x199   :  { %v3105_v15 = vpop.eup %3104  ;;  %v2286_v16 = vmul.f32 %v3103_v13, %v2262_v10 }
 0x19a   :  { %v3107_v17 = vpop.eup %3106  ;;  %v2291_v18 = vmul.f32 %v3105_v15, %v2258_v9 }
 0x19b   :  { %v2297_v19 = vadd.f32 %v2286_v16, %v2285_v14  ;;  %v2292_v20 = vmul.f32 %v3107_v17, %v2262_v10  ;;  %v2312_v10 = vstv %s3351_s0 }
 0x19d   :  { %v2304_v21 = vadd.f32 %v2292_v20, %v2291_v18 }
 0x209   :  { %v2103_v25 = vpop.f32.mrb[4].mxu1 }
 0x20a   :  { %v2626_v6 = vadd.f32 %v2103_v25, %v365_v24  ;;  %v2105_v26 = vpop.f32.mrb[5].mxu1 }
 0x20b   :  { %v2627_v27 = vadd.f32 %v2105_v26, %v369_v7  ;;  %v2107_v28 = vpop.f32.mrb[6].mxu1 }
 0x20c   :  { %3108 = vtanh.f32 %v2626_v6  ;;  %v2628_v49 = vadd.f32 %v2107_v28, %v365_v24  ;;  %v2109_v34 = vpop.f32.mrb[7].mxu1 }
 0x20d   :  { %3110 = vtanh.f32 %v2627_v27  ;;  %v2629_v48 = vadd.f32 %v2109_v34, %v369_v7 }
 0x20e   :  { %3112 = vtanh.f32 %v2628_v49 }
 0x20f   :  { %3114 = vtanh.f32 %v2629_v48 }
 0x216   :  { %v3109_v31 = vpop.eup %3108 }
 0x217   :  { %v3111_v32 = vpop.eup %3110  ;;  %v2287_v33 = vmul.f32 %v3109_v31, %v2266_v29 }
 0x218   :  { %v3113_v35 = vpop.eup %3112  ;;  %v2288_v36 = vmul.f32 %v3111_v32, %v2270_v30 }
 0x219   :  { %v3115_v37 = vpop.eup %3114  ;;  %v2298_v38 = vadd.f32 %v2297_v19, %v2287_v33  ;;  %v2293_v39 = vmul.f32 %v3113_v35, %v2266_v29 }
 0x21a   :  { %v2294_v40 = vmul.f32 %v3115_v37, %v2270_v30 }
 0x21b   :  { %v2299_v41 = vadd.f32 %v2298_v38, %v2288_v36  ;;  %v2305_v42 = vadd.f32 %v2304_v21, %v2293_v39 }
 0x21d   :  { %v2306_v43 = vadd.f32 %v2305_v42, %v2294_v40 }
 0x24a   :  { %v2232_v50 = vpop.f32.mrb[4].mxu0 }
 0x24b   :  { %v2630_v51 = vadd.f32 %v2232_v50, %v373_v46  ;;  %v2234_v52 = vpop.f32.mrb[5].mxu0 }
 0x24c   :  { %v2631_v54 = vadd.f32 %v2234_v52, %v377_v47  ;;  %v2236_v56 = vpop.f32.mrb[6].mxu0 }
 0x24d   :  { %3116 = vtanh.f32 %v2630_v51  ;;  %v2632_v57 = vadd.f32 %v2236_v56, %v373_v46  ;;  %v2238_v58 = vpop.f32.mrb[7].mxu0 }
 0x24e   :  { %3118 = vtanh.f32 %v2631_v54  ;;  %v2633_v59 = vadd.f32 %v2238_v58, %v377_v47 }
 0x24f   :  { %3120 = vtanh.f32 %v2632_v57 }
 0x250   :  { %3122 = vtanh.f32 %v2633_v59 }
 0x257   :  { %v3117_v62 = vpop.eup %3116 }
 0x258   :  { %v3119_v53 = vpop.eup %3118  ;;  %v2289_v63 = vmul.f32 %v3117_v62, %v2274_v60 }
 0x259   :  { %v3121_v0 = vpop.eup %3120  ;;  %v2290_v11 = vmul.f32 %v3119_v53, %v2278_v61 }
 0x25a   :  { %v3123_v55 = vpop.eup %3122  ;;  %v2300_v1 = vadd.f32 %v2299_v41, %v2289_v63  ;;  %v2295_v2 = vmul.f32 %v3121_v0, %v2274_v60 }
 0x25b   :  { %v2296_v3 = vmul.f32 %v3123_v55, %v2278_v61 }
 0x25c   :  { %v2301_v4 = vadd.f32 %v2300_v1, %v2290_v11  ;;  %v2307_v5 = vadd.f32 %v2306_v43, %v2295_v2 }
 0x25e   :  { %2302 = vadd.xlane.f32.xlu0 %v2301_v4  ;;  %v2308_v9 = vadd.f32 %v2307_v5, %v2296_v3 }
 0x262   :  { %2309 = vadd.xlane.f32.xlu0 %v2308_v9 }
 0x2eb   :  { %v2303_v8 = vpop.xlane.xlu0 %2302 }
 0x2ec   :  { %v2313_v12 = vadd.f32 %v2312_v10, %v2303_v8 }
 0x2ee   :  { %2316 = vst.msk [vmem:[%s3356_s5] sm:$0xff] %vm2315_vm0, %v2313_v12 }
 0x2ef   :  { %v2310_v13 = vpop.xlane.xlu0 %2309 }
 0x2f0   :  { %v2314_v14 = vadd.f32 %v2312_v10, %v2310_v13 }
 0x2f2   :  { %2317 = vst.msk [vmem:[%s3356_s5 + $0x8] sm:$0xff] %vm2315_vm0, %v2314_v14 }
 0x2f3   :  { %2322 = vsyncpa [#allocation4], 1 }
 0x2f4   :  { %2323 = vsyncpa [#allocation6], 1 }

</bundles_post_ra>
